<compile_context>
chip_gen: v7x
topology: tpu7x:2x2x1
jax: 0.10.0
libtpu: 0.0.40
codegen_flags: <defaults>
</compile_context>

<pallas_src>
import jax
import jax.numpy as jnp
from jax.experimental import pallas as pl
from jax.experimental.pallas import tpu as pltpu


def _round_up(x, m):
    return ((x + m - 1) // m) * m


def gate_nn_kernel(x_ref, w_ref, b_ref, o_ref):
    # x_ref: [tile_n, D] VMEM; w_ref: [1, D] VMEM (resident); b_ref: [1] SMEM;
    # o_ref: [1, 1, tile_n] VMEM (lane-dense output row).
    x = x_ref[...].astype(jnp.float32)
    w = w_ref[...].astype(jnp.float32)            # [1, D], broadcast over rows
    # VPU multiply + lane reduce; f32 accumulation. The relayout of the
    # [tile_n] reduction result into lanes rides the XLU slot (idle here).
    row = jnp.sum(x * w, axis=1) + b_ref[0]       # [tile_n]
    o_ref[0, 0, :] = row.astype(o_ref.dtype)


def gate_nn_forward(x, w, b, *, target_block_bytes=4 * 1024 * 1024,
                    min_grid_steps=8):
    """x: [N, D]; w: nn.Linear weight ([1, D] or [D, 1]); b: bias (any shape
    with 1 element). Returns [N, 1] = Linear(x) with eval-mode Dropout."""
    N, D = x.shape
    itemsize = jnp.dtype(x.dtype).itemsize

    # Normalize parameter shapes.
    w_row = jnp.asarray(w).reshape(1, D).astype(x.dtype)
    b_smem = jnp.asarray(b, dtype=jnp.float32).reshape(1)

    # --- tile sizing against the TRUE VMEM footprint -------------------------
    # A [tile_n, D] block lives in (8, 128) native tiles: each row occupies
    # round_up(D, 128) lanes regardless of D; the (1, 1, tile_n) output block
    # pads its sublane dim to 8.
    d_pad = _round_up(D, 128)
    row_bytes = d_pad * itemsize
    tile_n = max(8, (target_block_bytes // row_bytes) // 8 * 8)
    # v7x megacore balance: keep at least ~min_grid_steps grid steps so both
    # TensorCores get work (per-step overhead ~0.35us is negligible vs. the
    # multi-100KiB tile DMAs at the HBM roofline).
    tile_n = min(tile_n, max(8, _round_up(pl.cdiv(N, min_grid_steps), 8)))
    # Never larger than (sublane-rounded) N.
    tile_n = min(tile_n, _round_up(N, 8))
    if tile_n >= 128:                      # denser lane stores when possible
        tile_n = (tile_n // 128) * 128
    num_tiles = pl.cdiv(N, tile_n)

    # True double-buffered VMEM footprint (x tile + weight row + output row).
    x_buf = tile_n * d_pad * itemsize
    w_buf = 8 * d_pad * itemsize
    o_buf = 8 * tile_n * itemsize
    vmem_needed = 2 * (x_buf + w_buf + o_buf)
    # Explicit limit with headroom; stays under v5e/v6e scoped defaults and
    # well under v7x's 64 MiB physical VMEM.
    vmem_limit = int(min(max(2 * vmem_needed + (2 << 20), 16 << 20), 48 << 20))

    out = pl.pallas_call(
        gate_nn_kernel,
        out_shape=jax.ShapeDtypeStruct((num_tiles, 1, tile_n), x.dtype),
        grid=(num_tiles,),
        in_specs=[
            # x tile, streamed & double-buffered; final block is clipped by
            # Pallas (no wrapper-side padding copy of x).
            pl.BlockSpec((tile_n, D), lambda i: (i, 0)),
            # weight row, VMEM-resident (same block every step -> no re-DMA).
            pl.BlockSpec((1, D), lambda i: (0, 0)),
            # bias scalar in SMEM.
            pl.BlockSpec(memory_space=pltpu.SMEM),
        ],
        # Lane-dense output: every (1, 1, tile_n) block is full -> unmasked
        # stores; rows past N are garbage from the clipped input tile and are
        # sliced off below.
        out_specs=pl.BlockSpec((1, 1, tile_n), lambda i: (i, 0, 0)),
        compiler_params=pltpu.CompilerParams(
            dimension_semantics=("parallel",),      # megacore shard on v7x
            vmem_limit_bytes=vmem_limit,
        ),
        cost_estimate=pl.CostEstimate(
            flops=2 * N * D,
            bytes_accessed=itemsize * (N * D + D + N),
            transcendentals=0,
        ),
    )(x, w_row, b_smem)

    # Row-major reshape back to [N, 1] (free); drop the clipped tail rows.
    return out.reshape(num_tiles * tile_n)[:N, None]


if __name__ == "__main__":
    in_channels = 32   # D (hidden size)
    num_nodes = 10     # N (graph nodes) — deliberately not a multiple of 8

    key = jax.random.PRNGKey(0)
    kx, kw, kb = jax.random.split(key, 3)

    # Deterministic synthetic parameters (shapes per nn.Linear(in_channels, 1)).
    x = jax.random.normal(kx, (num_nodes, in_channels), dtype=jnp.float32)
    w = jax.random.normal(kw, (1, in_channels), dtype=jnp.float32) * 0.1
    b = jax.random.normal(kb, (1,), dtype=jnp.float32) * 0.1

    out = jax.block_until_ready(gate_nn_forward(x, w, b))
    ref = x @ w.T + b            # Linear + eval-mode Dropout == identity
    assert out.shape == (num_nodes, 1), out.shape
    assert jnp.allclose(out, ref, atol=1e-5, rtol=1e-5), "mismatch vs reference"

    # Second check: tiny tile budget -> multi-step pipelined grid with a
    # clipped (partial) final block.
    n2 = 44
    x2 = jax.random.normal(jax.random.PRNGKey(1), (n2, in_channels), jnp.float32)
    out2 = jax.block_until_ready(
        gate_nn_forward(x2, w, b, target_block_bytes=4096))
    ref2 = x2 @ w.T + b
    assert out2.shape == (n2, 1), out2.shape
    assert jnp.allclose(out2, ref2, atol=1e-5, rtol=1e-5), "mismatch (multi-tile)"

    print("KERNEL_OK")
</pallas_src>

<mosaic_0001>
module attributes {stable_mosaic.version = 11 : i64} {
  func.func @gate_nn_kernel(%arg0: i32, %arg1: memref<8x32xf32, #tpu.memory_space<vmem>>, %arg2: memref<1x32xf32, #tpu.memory_space<vmem>>, %arg3: memref<1xf32, #tpu.memory_space<smem>>, %arg4: memref<1x1x8xf32, #tpu.memory_space<vmem>>) attributes {dimension_semantics = [#tpu.dimension_semantics<parallel>], iteration_bounds = array<i64: 2>, scalar_prefetch = 0 : i64, scratch_operands = 0 : i64, tpu.core_type = #tpu.core_type<tc>, window_params = [{transform_indices = @transform_0, window_bounds = array<i64: 8, 32>}, {pipeline_mode = #tpu.pipeline_mode<synchronous>, transform_indices = @transform_1, window_bounds = array<i64: 1, 32>}, {transform_indices = @transform_2, window_bounds = array<i64: 1>}, {transform_indices = @transform_3, window_bounds = array<i64: 1, 1, 8>}]} {
    %c0 = arith.constant 0 : index
    %c0_0 = arith.constant 0 : index
    %0 = vector.load %arg1[%c0, %c0_0] : memref<8x32xf32, #tpu.memory_space<vmem>>, vector<8x32xf32>
    %c0_1 = arith.constant 0 : index
    %c0_2 = arith.constant 0 : index
    %1 = vector.load %arg2[%c0_1, %c0_2] : memref<1x32xf32, #tpu.memory_space<vmem>>, vector<1x32xf32>
    %2 = vector.broadcast %1 : vector<1x32xf32> to vector<8x32xf32>
    %3 = arith.mulf %0, %2 : vector<8x32xf32>
    %cst = arith.constant dense<0.000000e+00> : vector<8xf32>
    %4 = vector.multi_reduction <add>, %3, %cst [1] : vector<8x32xf32> to vector<8xf32>
    %c0_3 = arith.constant 0 : index
    %5 = memref.load %arg3[%c0_3] : memref<1xf32, #tpu.memory_space<smem>>
    %6 = vector.broadcast %5 : f32 to vector<8xf32>
    %7 = arith.addf %4, %6 : vector<8xf32>
    %c0_4 = arith.constant 0 : index
    %c0_5 = arith.constant 0 : index
    %c0_6 = arith.constant 0 : index
    %8 = vector.load %arg4[%c0_4, %c0_5, %c0_6] : memref<1x1x8xf32, #tpu.memory_space<vmem>>, vector<1x1x8xf32>
    %9 = vector.shape_cast %8 : vector<1x1x8xf32> to vector<8xf32>
    %10 = vector.shape_cast %7 : vector<8xf32> to vector<1x1x8xf32>
    tpu.vector_store %arg4[%c0_4, %c0_5, %c0_6], %10 {strides = array<i32>} : memref<1x1x8xf32, #tpu.memory_space<vmem>>, vector<1x1x8xf32>,
    return
  }
  func.func @transform_0(%arg0: i32) -> (i32, i32) {
    %c0_i32 = arith.constant 0 : i32
    %c0_i32_0 = arith.constant 0 : i32
    return %arg0, %c0_i32 : i32, i32
  }
  func.func @transform_1(%arg0: i32) -> (i32, i32) {
    %c0_i32 = arith.constant 0 : i32
    %c0_i32_0 = arith.constant 0 : i32
    %c0_i32_1 = arith.constant 0 : i32
    return %c0_i32, %c0_i32_0 : i32, i32
  }
  func.func @transform_2(%arg0: i32) -> i32 {
    %c0_i32 = arith.constant 0 : i32
    %c0_i32_0 = arith.constant 0 : i32
    return %c0_i32 : i32
  }
  func.func @transform_3(%arg0: i32) -> (i32, i32, i32) {
    %c0_i32 = arith.constant 0 : i32
    %c0_i32_0 = arith.constant 0 : i32
    %c0_i32_1 = arith.constant 0 : i32
    return %arg0, %c0_i32, %c0_i32_0 : i32, i32, i32
  }
}

</mosaic_0001>

<bundles_post_ra>
// kernel: tpu_custom_call.1
= control target key start
LH: loop header
LB: loop body
LE: loop exit
PB: predicated region body
PF: predicated region fallthrough
CT: control target
= control target key end

     0   :  { %s636_s0 = inlined_call_operand.hbm [shape: f32[10,32], index: 0, kind: input, shape index: {}]   ;;  %s637_s1 = inlined_call_operand.vmem [shape: f32[1,32], index: 1, kind: input, shape index: {}]   ;;  %s638_s2 = inlined_call_operand.<no memory space> [shape: f32[1], index: 2, kind: input, shape index: {}]   ;;  %s639_s3 = inlined_call_operand.hbm [shape: f32[2,1,8], index: 3, kind: output, shape index: {}]  }
   0x1   :  { %8 = sst [smem:[#allocation2]] %s638_s2 }
   0x2   :  { %9 = vsyncpa [#allocation4], 0 }
   0x3   :  { %11 = vsyncpa [#allocation4 + $0x1], 0 }
   0x4   :  { %12 = vsyncpa [#allocation5], 0 }
   0x5   :  { %14 = vsyncpa [#allocation5 + $0x1], 0  ;;  %s471_s14 = smov 0   ;;  %s473_s15 = smov 0  }
   0x6   :  { %s475_s16 = smov 0   ;;  %s477_s17 = smov 0  }
   0x7 LB: > { %s492_s2 = sadd.s32 4294967295, %s444_s17   ;;  %s291_s18 = sadd.s32 4294967294, %s444_s17   ;;  %s444_s17 = sphi %s477_s17, %s654_s17   ;;  %s440_s16 = sphi %s475_s16, %s653_s16   ;;  %s436_s15 = sphi %s473_s15, %s652_s15   ;;  %s432_s14 = sphi %s471_s14, %s651_s14  }
   0x8   : > { %s496_s19 = sadd.s32 1, %s444_s17   ;;  %s27_s20 = sadd.s32 1, %s440_s16 }
   0x9   : > { %s24_s21 = ssub.s32 %s444_s17, %s496_s19  ;;  %p34_p0 = scmp.ne.s32.totalorder %s440_s16, %s436_s15 }
   0xa   : > { %p25_p1 = scmp.eq.s32.totalorder %s24_s21, 0  ;;  %p35_p2 = scmp.eq.s32.totalorder %s444_s17, 0 }
   0xb   : > { %p40_p3 = scmp.ne.s32.totalorder %s436_s15, %s432_s14  ;;  %p41_p4 = scmp.eq.s32.totalorder %s492_s2, 0 }
   0xc   : > { %s508_s22 = scalar_select %p25_p1, %s440_s16, %s27_s20  }
   0xd   : > { %p510_p5 = por %p35_p2, %p34_p0  ;;  %p514_p6 = por %p41_p4, %p40_p3 }
   0xe   : > { %p106_p7 = scmp.eq.s32.totalorder %s492_s2, 1  ;;  %p112_p8 = scmp.eq.s32.totalorder %s291_s18, 1 }
   0xf   : > { %p314_p10 = scmp.lt.s32.totalorder %s444_s17, 2  ;;  %s138_s27 = sand.u32 1, %s440_s16  }
  0x10   : > { %p521_p11 = por %p106_p7, %p34_p0  ;;  %p525_p12 = por %p112_p8, %p40_p3 }
  0x11   : > { %s295_s28 = sshll.u32 %s444_s17, 7  ;;  %s294_s29 = sshll.u32 %s138_s27, 3 }
  0x12   : > { %s643_s25 = scalar_select %p521_p11, 1, 0 }
  0x13   : > { %s644_s26 = scalar_select %p525_p12, 1, 0 }
  0x14   : > { %s534_s5 = scalar_lea.hbm %s636_s0, %s295_s28  ;;  %s142_s6 = scalar_lea.vmem [#allocation3], %s294_s29 }
  0x15   : > { %s149_s7 = sshll.u32 %s142_s6, 4  ;;  %p538_p13 = pnand %p314_p10, %p510_p5  ;;  %s542_s7 = int_to_ptr.vmem [resolvable:$true] %s149_s7 }
  0x16   : > { %s139_s9 = scalar_lea.sflag [#allocation4], %s138_s27  ;;  %s348_s10 = scalar_lea.hbm %s534_s5, 128 }
  0x17   : > { %p349_p2 = scmp.ne.s32.totalorder %s534_s5, %s348_s10  ;;  %p350_p3 = pneg %p538_p13 }
  0x18   : > { %s353_s13 = scalar_lea.hbm %s636_s0, 256  ;;  %p354_p5 = scmp.lt.u32.totalorder %s534_s5, %s636_s0 }
  0x19   : > { %p351_p4 = pnand %p350_p3, %p349_p2  ;;  %p355_p8 = scmp.lt.u32.totalorder %s353_s13, %s348_s10 }
  0x1a   : > { %p357_p9 = scmp.lt.u32.totalorder %s348_s10, %s534_s5 }
  0x1b   : > { %p352_p7 = pneg %p351_p4  ;;  %p356_p10 = por %p355_p8, %p354_p5 }
  0x1d   : > { %p358_p0 = por %p357_p9, %p356_p10 }
  0x1f   : > { %p359_p1 = pnand %p358_p0, %p352_p7 }
  0x21   : > { %362 = shalt.err (!%p359_p1)
}
  0x22   : > { %s363_s21 = scalar_lea.vmem %s542_s7, 128  ;;  %s446_s23 = smov [#allocation3]  }
  0x23   : > { %p364_p2 = scmp.ne.s32.totalorder %s542_s7, %s363_s21  ;;  %s368_s27 = sshll.u32 %s446_s23, 4  ;;  %s369_s27 = int_to_ptr.vmem [resolvable:$false] %s368_s27 }
  0x24   : > { %s370_s28 = scalar_lea.vmem %s369_s27, 256  ;;  %p371_p11 = scmp.lt.s32.totalorder %s542_s7, %s369_s27 }
  0x25   : > { %p366_p4 = pnand %p364_p2, %p350_p3  ;;  %p372_p5 = scmp.lt.s32.totalorder %s370_s28, %s363_s21 }
  0x27   : > { %p367_p12 = pneg %p366_p4  ;;  %p373_p8 = por %p372_p5, %p371_p11 }
  0x29   : > { %p374_p9 = pnand %p373_p8, %p367_p12 }
  0x2b   : > { %377 = shalt.err (!%p374_p9)
}
  0x2c   : > { %309 = dma.hbm_to_vmem [thread:$0]  (!%p538_p13), %s534_s5, 128, %s542_s7, %s139_s9  }
  0x2d   : > { %p646_p0 = scmp.lt.s32.totalorder %s444_s17, 3  ;;  %p647_p1 = scmp.ge.s32.totalorder %s444_s17, 1 }
  0x2f   : > { %p155_p3 = pnand %p647_p1, %p646_p0 }
  0x30   : > { %s576_s29 = sand.u32 (!%p155_p3), 1, %s436_s15  }
  0x31   : > { %158 = sbr.rel (%p155_p3) target bundleno = 222 (0xde), region = 32  ;;  %s297_s30 = sshll.u32 (!%p155_p3), %s576_s29, 3 }
  0x32   : > { %s161_s4 = scalar_lea.sflag (!%p155_p3), [#allocation4], %s576_s29  ;;  %s164_s6 = scalar_lea.vmem (!%p155_p3), [#allocation3], %s297_s30 }
  0x38   : > { %423 = dma.done.wait (%p514_p6), %s161_s4, 128  }
  0x39   : > { %425 = vsyncadd (%p514_p6), %s161_s4, 4294967168  ;;  %v186_v0 = vld [vmem:[%s164_s6] sm:$0xff]  ;;  %vm195_vm0 = vcmask 261120   ;;  %s199_s8 = sld [smem:[#allocation2]]  ;;  %v203_v4 = vlaneseq  ;;  %s299_s24 = sshll.u32 %s492_s2, 4  ;;  %vm210_vm1 = vcmask 57344  }
  0x3a   : > { %v298_v1 = vld [vmem:[%s637_s1] ss:$0 sm:$0xff]  ;;  %s185_s9 = scalar_lea.vmem [#allocation6], %s576_s29  ;;  %s592_s13 = scalar_lea.hbm %s639_s3, %s299_s24 }
  0x3b   : > { %v194_v2 = vmul.f32 %v298_v1, %v186_v0  ;;  %v204_v5 = vand.u32 127, %v203_v4  ;;  %v206_v6 = vshrl.u32 %v203_v4, 7  ;;  %s225_s10 = sshll.u32 %s185_s9, 4  ;;  %s213_s18 = scalar_lea.sflag [#allocation5], %s576_s29  ;;  %s594_s10 = int_to_ptr.vmem [resolvable:$true] %s225_s10 }
  0x3c   : > { %s378_s20 = scalar_lea.vmem %s594_s10, 16  ;;  %p648_p11 = scmp.ne.s32.totalorder %s643_s25, 0 }
  0x3d   : > { %v196_v3 = vsel %vm195_vm0, %v194_v2, 0.0  ;;  %v207_v8 = vsub.s32 %v204_v5, %v206_v6  ;;  %p379_p6 = scmp.ne.s32.totalorder %s594_s10, %s378_s20  ;;  %s447_s2 = smov [#allocation6]  }
  0x3e   : > { %197 = vadd.xlane.f32.xlu0 %v196_v3  ;;  %s382_s21 = sshll.u32 %s447_s2, 4  ;;  %s383_s21 = int_to_ptr.vmem [resolvable:$false] %s382_s21 }
  0x3f   : > { %v200_v7 = vstv %s199_s8  ;;  %p380_p12 = pnand %p379_p6, %p648_p11  ;;  %s384_s23 = scalar_lea.vmem %s383_s21, 32 }
  0x40   : > { %p385_p7 = scmp.lt.s32.totalorder %s594_s10, %s383_s21  ;;  %p386_p10 = scmp.lt.s32.totalorder %s384_s23, %s378_s20 }
  0x41   : > { %p381_p13 = pneg %p380_p12 }
  0x42   : > { %p387_p2 = por %p386_p10, %p385_p7 }
  0x44   : > { %p388_p4 = pnand %p387_p2, %p381_p13 }
  0xcb   : > { %v198_v9 = vpop.xlane.xlu0 %197 }
  0xcc   : > { %v201_v10 = vadd.f32 %v200_v7, %v198_v9 }
  0xce   : > { %v208_v11 = vrot.slane %v201_v10, %v207_v8 }
  0xd0   : > { %211 = vst.msk [vmem:[%s185_s9] sm:$0x1] %vm210_vm1, %v208_v11 }
  0xd1   : > { %391 = shalt.err (!%p388_p4)
}
  0xd2   : > { %s392_s27 = scalar_lea.hbm %s592_s13, 16  ;;  %s396_s30 = scalar_lea.hbm %s639_s3, 32 }
  0xd3   : > { %p393_p5 = scmp.ne.s32.totalorder %s592_s13, %s392_s27  ;;  %p397_p0 = scmp.lt.u32.totalorder %s592_s13, %s639_s3 }
  0xd4   : > { %p398_p1 = scmp.lt.u32.totalorder %s396_s30, %s392_s27  ;;  %p400_p6 = scmp.lt.u32.totalorder %s392_s27, %s592_s13 }
  0xd5   : > { %p394_p8 = pnand %p393_p5, %p648_p11 }
  0xd6   : > { %p399_p3 = por %p398_p1, %p397_p0 }
  0xd7   : > { %p395_p9 = pneg %p394_p8 }
  0xd8   : > { %p401_p12 = por %p400_p6, %p399_p3 }
  0xda   : > { %p402_p13 = pnand %p401_p12, %p395_p9 }
  0xdc   : > { %405 = shalt.err (!%p402_p13)
}
  0xdd   : > { %304 = dma.vmem_to_hbm [thread:$0]  (%p648_p11), %s594_s10, 16, %s592_s13, %s213_s18  }
  0xde PF: > { %s237_s5 = sand.u32 1, %s432_s14   ;;  %p649_p7 = scmp.ne.s32.totalorder %s644_s26, 0 }
  0xdf   : > { %p650_p10 = scmp.ge.s32.totalorder %s444_s17, 2  ;;  %s238_s7 = scalar_lea.sflag [#allocation5], %s237_s5 }
  0xe1   : > { %p311_p2 = pnand %p650_p10, %p649_p7 }
  0xe3   : > { %427 = dma.done.wait (!%p311_p2), %s238_s7, 16  }
  0xe4   : > { %429 = vsyncadd (!%p311_p2), %s238_s7, 4294967280  ;;  %p17_p4 = scmp.ge.s32.totalorder %s496_s19, 4   ;;  %s651_s14 = smov %s436_s15 }
  0xe5   : > { %s652_s15 = smov %s440_s16  ;;  %s653_s16 = smov %s508_s22 }
  0xe6   : > { %s654_s17 = smov %s496_s19  ;;  %19 = sbr.rel (!%p17_p4) target bundleno = 7 (0x7), region = 77 }
  0xed   :  { %242 = vsyncpa [#allocation4], 1 }
  0xee   :  { %244 = vsyncpa [#allocation4 + $0x1], 1 }
  0xef   :  { %245 = vsyncpa [#allocation5], 1 }
  0xf0   :  { %247 = vsyncpa [#allocation5 + $0x1], 1 }

</bundles_post_ra>
